<compile_context>
chip_gen: v7x
topology: tpu7x:2x2x1
jax: 0.10.0
libtpu: 0.0.40
codegen_flags: <defaults>
</compile_context>

<pallas_src>
import functools

import jax
import jax.numpy as jnp
from jax.experimental import pallas as pl
from jax.experimental.pallas import tpu as pltpu


NEG_SLOPE = 0.03  # matches torch.nn.functional.leaky_relu(..., negative_slope=0.03)


def _leaky_relu(x, slope=NEG_SLOPE):
    return jnp.where(x >= 0, x, slope * x)


def _round_up(n, m):
    return ((n + m - 1) // m) * m


def _mlp_kernel(x_ref, w_ref, b_ref, o_ref, *, n_layers):
    # Whole MLP fused in one kernel: the (TM, H) activation stays in registers
    # across layers; packed weights/biases are VMEM-resident across the batch grid.
    h = x_ref[...]                                            # (TM, H) f32
    for i in range(n_layers):
        # bf16 MXU inputs, f32 accumulation.
        h = jnp.dot(h.astype(jnp.bfloat16), w_ref[i],
                    preferred_element_type=jnp.float32)       # (TM, H) f32
        h = h + b_ref[i]                                      # bias add in f32
        if i < n_layers - 1:                                  # no activation on last layer
            h = _leaky_relu(h)
    o_ref[...] = h.astype(o_ref.dtype)


def nonlinear_forward(x, params, *, tm=128):
    """Pallas forward pass for `Nonlinear`.

    x: (B, H) f32.  params: list of (W_i, b_i) pairs, W_i: (H, H), b_i: (H,).

    NOTE (module quirk): the PyTorch module adds a bias of length layer_sizes[i]
    (the layer *input* width) to an output of width layer_sizes[i+1]; this only
    broadcasts when adjacent sizes are equal, so equal hidden sizes are required.
    """
    H = x.shape[-1]
    n_layers = len(params)
    for (w, b) in params:
        assert w.shape == (H, H) and b.shape == (H,), (
            "bias-broadcast quirk of the module requires equal layer sizes")

    B = x.shape[0]

    # Pack operands: fewer, larger DMAs.  Weights stored bf16 for native MXU rate.
    w_packed = jnp.stack([w for (w, _) in params]).astype(jnp.bfloat16)   # (L, H, H) bf16
    b_packed = jnp.stack([b.reshape(1, H) for (_, b) in params])          # (L, 1, H) f32

    # Batch tiling: tm rows per grid step (multiple of 8 sublanes); pad B if needed.
    tm = _round_up(min(tm, _round_up(B, 8)), 8)
    b_pad = _round_up(B, tm)
    if b_pad != B:
        x = jnp.pad(x, ((0, b_pad - B), (0, 0)))
    grid = (b_pad // tm,)

    out = pl.pallas_call(
        functools.partial(_mlp_kernel, n_layers=n_layers),
        out_shape=jax.ShapeDtypeStruct((b_pad, H), jnp.float32),
        grid=grid,
        in_specs=[
            pl.BlockSpec((tm, H), lambda i: (i, 0)),                 # x tile, pipelined
            pl.BlockSpec((n_layers, H, H), lambda i: (0, 0, 0)),     # weights, resident
            pl.BlockSpec((n_layers, 1, H), lambda i: (0, 0, 0)),     # biases, resident
        ],
        out_specs=pl.BlockSpec((tm, H), lambda i: (i, 0)),
        compiler_params=pltpu.CompilerParams(
            # Batch tiles are independent -> megacore sharding on v7x; no-op on v5e/v6e.
            dimension_semantics=("parallel",),
        ),
    )(x, w_packed, b_packed)

    if b_pad != B:
        out = out[:B]
    # torch: return x.squeeze()
    return jnp.squeeze(out)


def init_params(key, layer_sizes):
    """~ torch.randn init, matching the module's parameter shapes exactly:
       W_i: (layer_sizes[i], layer_sizes[i+1]);  b_i: (layer_sizes[i],)."""
    params = []
    for i in range(len(layer_sizes) - 1):
        key, kw, kb = jax.random.split(key, 3)
        w = jax.random.normal(kw, (layer_sizes[i], layer_sizes[i + 1]), jnp.float32)
        b = jax.random.normal(kb, (layer_sizes[i],), jnp.float32)
        params.append((w, b))
    return params


def reference_forward(x, params, *, mxu_dtype=jnp.float32):
    """Pure-JAX reference mirroring the PyTorch loop.  mxu_dtype=bfloat16 reproduces
    the kernel's mixed-precision (bf16 inputs, f32 accumulation) math exactly."""
    h = x
    n = len(params)
    for i, (w, b) in enumerate(params):
        h = jnp.dot(h.astype(mxu_dtype), w.astype(mxu_dtype),
                    preferred_element_type=jnp.float32)
        h = h + b.astype(jnp.float32)
        if i < n - 1:
            h = _leaky_relu(h)
    return jnp.squeeze(h)


if __name__ == "__main__":
    # Equal hidden sizes (required by the module's bias-broadcast quirk),
    # 128-wide features for lane-dense vregs / MXU-aligned dots, and a batch
    # large enough that the batch grid + megacore sharding actually engage.
    layer_sizes = [128, 128, 128, 128]
    batch = 256

    key = jax.random.PRNGKey(0)
    key, kx = jax.random.split(key)
    x = jax.random.normal(kx, (batch, layer_sizes[0]), jnp.float32)
    params = init_params(key, layer_sizes)

    out = jax.block_until_ready(nonlinear_forward(x, params))

    # Tight check against a reference with identical bf16-fed / f32-accumulated math.
    ref_bf16 = reference_forward(x, params, mxu_dtype=jnp.bfloat16)
    assert out.shape == ref_bf16.shape
    assert jnp.allclose(out, ref_bf16, rtol=1e-3, atol=1e-1), "mismatch vs bf16 reference"

    # Sanity check against the full-f32 torch semantics (only mixed-precision drift).
    ref_f32 = reference_forward(x, params, mxu_dtype=jnp.float32)
    scale = float(jnp.max(jnp.abs(ref_f32))) + 1e-6
    rel_err = float(jnp.max(jnp.abs(out - ref_f32))) / scale
    assert rel_err < 5e-2, f"drift vs f32 reference too large: {rel_err}"

    print("KERNEL_OK")
</pallas_src>

<mosaic_0001>
module attributes {stable_mosaic.version = 11 : i64} {
  func.func @_mlp_kernel(%arg0: i32, %arg1: memref<128x128xf32, #tpu.memory_space<vmem>>, %arg2: memref<3x128x128xbf16, #tpu.memory_space<vmem>>, %arg3: memref<3x1x128xf32, #tpu.memory_space<vmem>>, %arg4: memref<128x128xf32, #tpu.memory_space<vmem>>) attributes {dimension_semantics = [#tpu.dimension_semantics<parallel>], iteration_bounds = array<i64: 2>, scalar_prefetch = 0 : i64, scratch_operands = 0 : i64, tpu.core_type = #tpu.core_type<tc>, window_params = [{transform_indices = @transform_0, window_bounds = array<i64: 128, 128>}, {pipeline_mode = #tpu.pipeline_mode<synchronous>, transform_indices = @transform_1, window_bounds = array<i64: 3, 128, 128>}, {pipeline_mode = #tpu.pipeline_mode<synchronous>, transform_indices = @transform_2, window_bounds = array<i64: 3, 1, 128>}, {transform_indices = @transform_3, window_bounds = array<i64: 128, 128>}]} {
    %c0 = arith.constant 0 : index
    %c0_0 = arith.constant 0 : index
    %0 = vector.load %arg1[%c0, %c0_0] : memref<128x128xf32, #tpu.memory_space<vmem>>, vector<128x128xf32>
    %1 = arith.truncf %0 : vector<128x128xf32> to vector<128x128xbf16>
    %c0_1 = arith.constant 0 : index
    %c0_2 = arith.constant 0 : index
    %c0_3 = arith.constant 0 : index
    %2 = vector.load %arg2[%c0_1, %c0_2, %c0_3] : memref<3x128x128xbf16, #tpu.memory_space<vmem>>, vector<1x128x128xbf16>
    %3 = vector.shape_cast %2 : vector<1x128x128xbf16> to vector<128x128xbf16>
    %cst = arith.constant dense<0.000000e+00> : vector<128x128xf32>
    %4 = tpu.matmul %1, %3, %cst {dimension_numbers = #tpu.dot_dimension_numbers<[1], [0], [0], [1], [0, 0, 1, 1], [], []>} : vector<128x128xbf16>, vector<128x128xbf16>, vector<128x128xf32> -> vector<128x128xf32>
    %c0_4 = arith.constant 0 : index
    %c0_5 = arith.constant 0 : index
    %c0_6 = arith.constant 0 : index
    %5 = vector.load %arg3[%c0_4, %c0_5, %c0_6] : memref<3x1x128xf32, #tpu.memory_space<vmem>>, vector<1x1x128xf32>
    %6 = vector.shape_cast %5 : vector<1x1x128xf32> to vector<1x128xf32>
    %7 = vector.broadcast %6 : vector<1x128xf32> to vector<128x128xf32>
    %8 = arith.addf %4, %7 : vector<128x128xf32>
    %cst_7 = arith.constant 0.000000e+00 : f32
    %9 = vector.broadcast %cst_7 : f32 to vector<128x128xf32>
    %10 = arith.cmpf oge, %8, %9 : vector<128x128xf32>
    %cst_8 = arith.constant 3.000000e-02 : f32
    %11 = vector.broadcast %cst_8 : f32 to vector<128x128xf32>
    %12 = arith.mulf %11, %8 : vector<128x128xf32>
    %13 = arith.select %10, %8, %12 : vector<128x128xi1>, vector<128x128xf32>
    %14 = arith.truncf %13 : vector<128x128xf32> to vector<128x128xbf16>
    %c1 = arith.constant 1 : index
    %c0_9 = arith.constant 0 : index
    %c0_10 = arith.constant 0 : index
    %15 = vector.load %arg2[%c1, %c0_9, %c0_10] : memref<3x128x128xbf16, #tpu.memory_space<vmem>>, vector<1x128x128xbf16>
    %16 = vector.shape_cast %15 : vector<1x128x128xbf16> to vector<128x128xbf16>
    %cst_11 = arith.constant dense<0.000000e+00> : vector<128x128xf32>
    %17 = tpu.matmul %14, %16, %cst_11 {dimension_numbers = #tpu.dot_dimension_numbers<[1], [0], [0], [1], [0, 0, 1, 1], [], []>} : vector<128x128xbf16>, vector<128x128xbf16>, vector<128x128xf32> -> vector<128x128xf32>
    %c1_12 = arith.constant 1 : index
    %c0_13 = arith.constant 0 : index
    %c0_14 = arith.constant 0 : index
    %18 = vector.load %arg3[%c1_12, %c0_13, %c0_14] : memref<3x1x128xf32, #tpu.memory_space<vmem>>, vector<1x1x128xf32>
    %19 = vector.shape_cast %18 : vector<1x1x128xf32> to vector<1x128xf32>
    %20 = vector.broadcast %19 : vector<1x128xf32> to vector<128x128xf32>
    %21 = arith.addf %17, %20 : vector<128x128xf32>
    %cst_15 = arith.constant 0.000000e+00 : f32
    %22 = vector.broadcast %cst_15 : f32 to vector<128x128xf32>
    %23 = arith.cmpf oge, %21, %22 : vector<128x128xf32>
    %cst_16 = arith.constant 3.000000e-02 : f32
    %24 = vector.broadcast %cst_16 : f32 to vector<128x128xf32>
    %25 = arith.mulf %24, %21 : vector<128x128xf32>
    %26 = arith.select %23, %21, %25 : vector<128x128xi1>, vector<128x128xf32>
    %27 = arith.truncf %26 : vector<128x128xf32> to vector<128x128xbf16>
    %c2 = arith.constant 2 : index
    %c0_17 = arith.constant 0 : index
    %c0_18 = arith.constant 0 : index
    %28 = vector.load %arg2[%c2, %c0_17, %c0_18] : memref<3x128x128xbf16, #tpu.memory_space<vmem>>, vector<1x128x128xbf16>
    %29 = vector.shape_cast %28 : vector<1x128x128xbf16> to vector<128x128xbf16>
    %cst_19 = arith.constant dense<0.000000e+00> : vector<128x128xf32>
    %30 = tpu.matmul %27, %29, %cst_19 {dimension_numbers = #tpu.dot_dimension_numbers<[1], [0], [0], [1], [0, 0, 1, 1], [], []>} : vector<128x128xbf16>, vector<128x128xbf16>, vector<128x128xf32> -> vector<128x128xf32>
    %c2_20 = arith.constant 2 : index
    %c0_21 = arith.constant 0 : index
    %c0_22 = arith.constant 0 : index
    %31 = vector.load %arg3[%c2_20, %c0_21, %c0_22] : memref<3x1x128xf32, #tpu.memory_space<vmem>>, vector<1x1x128xf32>
    %32 = vector.shape_cast %31 : vector<1x1x128xf32> to vector<1x128xf32>
    %33 = vector.broadcast %32 : vector<1x128xf32> to vector<128x128xf32>
    %34 = arith.addf %30, %33 : vector<128x128xf32>
    %c0_23 = arith.constant 0 : index
    %c0_24 = arith.constant 0 : index
    %35 = vector.load %arg4[%c0_23, %c0_24] : memref<128x128xf32, #tpu.memory_space<vmem>>, vector<128x128xf32>
    tpu.vector_store %arg4[%c0_23, %c0_24], %34 {strides = array<i32>} : memref<128x128xf32, #tpu.memory_space<vmem>>, vector<128x128xf32>,
    return
  }
  func.func @transform_0(%arg0: i32) -> (i32, i32) {
    %c0_i32 = arith.constant 0 : i32
    %c0_i32_0 = arith.constant 0 : i32
    return %arg0, %c0_i32 : i32, i32
  }
  func.func @transform_1(%arg0: i32) -> (i32, i32, i32) {
    %c0_i32 = arith.constant 0 : i32
    %c0_i32_0 = arith.constant 0 : i32
    %c0_i32_1 = arith.constant 0 : i32
    %c0_i32_2 = arith.constant 0 : i32
    return %c0_i32, %c0_i32_0, %c0_i32_1 : i32, i32, i32
  }
  func.func @transform_2(%arg0: i32) -> (i32, i32, i32) {
    %c0_i32 = arith.constant 0 : i32
    %c0_i32_0 = arith.constant 0 : i32
    %c0_i32_1 = arith.constant 0 : i32
    %c0_i32_2 = arith.constant 0 : i32
    return %c0_i32, %c0_i32_0, %c0_i32_1 : i32, i32, i32
  }
  func.func @transform_3(%arg0: i32) -> (i32, i32) {
    %c0_i32 = arith.constant 0 : i32
    %c0_i32_0 = arith.constant 0 : i32
    return %arg0, %c0_i32 : i32, i32
  }
}

</mosaic_0001>

<bundles_post_ra>
// kernel: tpu_custom_call.1
= control target key start
LH: loop header
LB: loop body
LE: loop exit
PB: predicated region body
PF: predicated region fallthrough
CT: control target
= control target key end

     0   :  { %8 = vsyncpa [#allocation3], 0  ;;  %s1728_s0 = inlined_call_operand.hbm [shape: f32[256,128], index: 0, kind: input, shape index: {}]   ;;  %s1729_s1 = inlined_call_operand.hbm [shape: bf16[3,128,128], index: 1, kind: input, shape index: {}]   ;;  %s1730_s2 = inlined_call_operand.vmem [shape: f32[3,1,128], index: 2, kind: input, shape index: {}]   ;;  %s1731_s3 = inlined_call_operand.hbm [shape: f32[256,128], index: 3, kind: output, shape index: {}]  }
   0x1   :  { %10 = vsyncpa [#allocation3 + $0x1], 0 }
   0x2   :  { %11 = vsyncpa [#allocation6], 0 }
   0x3   :  { %12 = vsyncpa [#allocation4], 0 }
   0x4   :  { %14 = vsyncpa [#allocation4 + $0x1], 0  ;;  %s1417_s12 = smov 0   ;;  %s1419_s13 = smov 0  }
   0x5   :  { %s1421_s14 = smov 0   ;;  %s1423_s15 = smov 0  }
   0x6 LB: > { %s1438_s16 = sadd.s32 4294967295, %s1386_s15   ;;  %s964_s17 = sadd.s32 4294967294, %s1386_s15   ;;  %s1386_s15 = sphi %s1423_s15, %s1751_s15   ;;  %s1382_s14 = sphi %s1421_s14, %s1750_s14   ;;  %s1378_s13 = sphi %s1419_s13, %s1749_s13   ;;  %s1374_s12 = sphi %s1417_s12, %s1748_s12  }
   0x7   : > { %p40_p0 = scmp.ne.s32.totalorder %s1378_s13, %s1374_s12  ;;  %p1732_p1 = scmp.eq.s32.totalorder %s1438_s16, 0 }
   0x8   : > { %p112_p3 = scmp.eq.s32.totalorder %s964_s17, 1  ;;  %p965_p5 = scmp.ge.s32.totalorder %s1386_s15, 1 }
   0x9   : > { %p1447_p4 = por %p1732_p1, %p40_p0  ;;  %p119_p7 = scmp.lt.s32.totalorder %s1386_s15, 3 }
   0xa   : > { %p1452_p6 = por %p112_p3, %p40_p0  ;;  %s1388_s21 = smov [#allocation5]  }
   0xb   : > { %s1735_s18 = scalar_select %p1447_p4, 1, 0 }
   0xc   : > { %s1736_s19 = scalar_select %p1452_p6, 1, 0 }
   0xd   : > { %p1457_p8 = pnand %p965_p5, %p119_p7  ;;  %s131_s22 = sshll.u32 %s1388_s21, 4  ;;  %s1461_s22 = int_to_ptr.vmem [resolvable:$true] %s131_s22 }
   0xe   : > { %s1473_s24 = sadd.s32 1, %s1386_s15   ;;  %s27_s25 = sadd.s32 1, %s1382_s14 }
   0xf   : > { %s1737_s20 = scalar_select %p1457_p8, 1, 0 }
  0x10   : > { %p1179_p9 = pneg %p1457_p8  ;;  %s24_s26 = ssub.s32 %s1386_s15, %s1473_s24 }
  0x11   : > { %s1258_s29 = scalar_lea.hbm %s1729_s1, 3072 }
  0x12   : > { %p1468_p11 = pnand %p1179_p9, %p1732_p1  ;;  %p1259_p12 = scmp.ne.s32.totalorder %s1729_s1, %s1258_s29 }
  0x13   : > { %p1265_p5 = scmp.lt.u32.totalorder %s1258_s29, %s1729_s1 }
  0x14   : > { %p1260_p13 = pneg %p1468_p11 }
  0x16   : > { %p1261_p0 = pnand %p1260_p13, %p1259_p12 }
  0x18   : > { %p1262_p3 = pneg %p1261_p0 }
  0x1a   : > { %p1267_p7 = pnand %p1265_p5, %p1262_p3 }
  0x1c   : > { %1270 = shalt.err (!%p1267_p7)
}
  0x1d   : > { %s1271_s7 = scalar_lea.vmem %s1461_s22, 3072  ;;  %p1279_p2 = scmp.lt.s32.totalorder %s1461_s22, %s1461_s22 }
  0x1e   : > { %p1272_p9 = scmp.ne.s32.totalorder %s1461_s22, %s1271_s7  ;;  %p1280_p6 = scmp.lt.s32.totalorder %s1271_s7, %s1271_s7 }
  0x20   : > { %p1274_p10 = pnand %p1272_p9, %p1260_p13  ;;  %p1281_p4 = por %p1280_p6, %p1279_p2 }
  0x22   : > { %p1275_p1 = pneg %p1274_p10 }
  0x24   : > { %p1282_p8 = pnand %p1281_p4, %p1275_p1 }
  0x26   : > { %1285 = shalt.err (!%p1282_p8)
}
  0x27   : > { %s1389_s8 = smov 64   ;;  %s1390_s9 = smov 4  }
  0x28   : > { %1182 = dma.hbm_to_vmem [thread:$0]  (!%p1468_p11), %s1729_s1, 3072, %s1461_s22, [#allocation6], %s1389_s8, %s1389_s8, %s1390_s9  }
  0x29   : > { %p25_p2 = scmp.eq.s32.totalorder %s24_s26, 0  ;;  %p34_p1 = scmp.ne.s32.totalorder %s1382_s14, %s1378_s13 }
  0x2a   : > { %p35_p4 = scmp.eq.s32.totalorder %s1386_s15, 0  ;;  %p1192_p6 = scmp.lt.s32.totalorder %s1386_s15, 2 }
  0x2b   : > { %s1504_s17 = scalar_select %p25_p2, %s1382_s14, %s27_s25  }
  0x2c   : > { %p36_p8 = por %p35_p4, %p34_p1  ;;  %p1739_p10 = scmp.eq.s32.totalorder %s1438_s16, 1 }
  0x2d   : > { %s148_s27 = sand.u32 1, %s1382_s14   ;;  %s1009_s28 = sshll.u32 %s1386_s15, 11 }
  0x2e   : > { %p1508_p12 = por %p1739_p10, %p34_p1  ;;  %s968_s29 = sshll.u32 %s148_s27, 7 }
  0x2f   : > { %s1517_s4 = scalar_lea.hbm %s1728_s0, %s1009_s28  ;;  %s152_s22 = scalar_lea.vmem [#allocation2], %s968_s29 }
  0x30   : > { %s159_s25 = sshll.u32 %s152_s22, 4  ;;  %p1519_p11 = pnand %p1192_p6, %p36_p8  ;;  %s1523_s25 = int_to_ptr.vmem [resolvable:$true] %s159_s25 }
  0x31   : > { %s1525_s5 = scalar_lea.sflag [#allocation3], %s148_s27  ;;  %s1286_s6 = scalar_lea.hbm %s1517_s4, 2048 }
  0x32   : > { %p1287_p13 = scmp.ne.s32.totalorder %s1517_s4, %s1286_s6  ;;  %p1288_p0 = pneg %p1519_p11 }
  0x33   : > { %s1291_s9 = scalar_lea.hbm %s1728_s0, 4096  ;;  %p1292_p7 = scmp.lt.u32.totalorder %s1517_s4, %s1728_s0 }
  0x34   : > { %p1289_p3 = pnand %p1288_p0, %p1287_p13  ;;  %p1293_p9 = scmp.lt.u32.totalorder %s1291_s9, %s1286_s6 }
  0x35   : > { %p1295_p1 = scmp.lt.u32.totalorder %s1286_s6, %s1517_s4 }
  0x36   : > { %p1290_p5 = pneg %p1289_p3  ;;  %p1294_p2 = por %p1293_p9, %p1292_p7 }
  0x38   : > { %p1296_p4 = por %p1295_p1, %p1294_p2 }
  0x3a   : > { %p1297_p6 = pnand %p1296_p4, %p1290_p5 }
  0x3c   : > { %1300 = shalt.err (!%p1297_p6)
}
  0x3d   : > { %s1301_s27 = scalar_lea.vmem %s1523_s25, 2048  ;;  %s1391_s28 = smov [#allocation2]  }
  0x3e   : > { %p1302_p8 = scmp.ne.s32.totalorder %s1523_s25, %s1301_s27  ;;  %s1306_s29 = sshll.u32 %s1391_s28, 4  ;;  %s1307_s29 = int_to_ptr.vmem [resolvable:$false] %s1306_s29 }
  0x3f   : > { %s1308_s23 = scalar_lea.vmem %s1307_s29, 4096  ;;  %p1309_p3 = scmp.lt.s32.totalorder %s1523_s25, %s1307_s29 }
  0x40   : > { %p1304_p10 = pnand %p1302_p8, %p1288_p0  ;;  %p1310_p7 = scmp.lt.s32.totalorder %s1308_s23, %s1301_s27 }
  0x42   : > { %p1305_p13 = pneg %p1304_p10  ;;  %p1311_p9 = por %p1310_p7, %p1309_p3 }
  0x44   : > { %p1312_p2 = pnand %p1311_p9, %p1305_p13 }
  0x46   : > { %1315 = shalt.err (!%p1312_p2)
}
  0x47   : > { %s1392_s30 = smov 128   ;;  %s1393_s22 = smov 8  }
  0x48   : > { %1186 = dma.hbm_to_vmem [thread:$0]  (!%p1519_p11), %s1517_s4, 2048, %s1523_s25, %s1525_s5, %s1392_s30, %s1392_s30, %s1393_s22  }
  0x49   : > { %p1742_p0 = scmp.ne.s32.totalorder %s1737_s20, 0 }
  0x4a   : > { %s1556_s6 = sand.u32 (!%p1742_p0), 1, %s1378_s13   ;;  %p1743_p5 = scmp.ne.s32.totalorder (!%p1742_p0), %s1735_s18, 0 }
  0x4b   : > { %171 = sbr.rel (%p1742_p0) target bundleno = 821 (0x335), region = 32  ;;  %s972_s7 = sshll.u32 (!%p1742_p0), %s1556_s6, 7 }
  0x4c   : > { %s174_s8 = scalar_lea.sflag (!%p1742_p0), [#allocation3], %s1556_s6  ;;  %s1562_s9 = scalar_lea.vmem (!%p1742_p0), [#allocation2], %s972_s7 }
  0x52   : > { %1361 = dma.done.wait (%p1743_p5), %s174_s8, 2048  }
  0x53   : > { %1363 = vsyncadd (%p1743_p5), %s174_s8, 4294965248  ;;  %p1744_p11 = scmp.eq.s32.totalorder %s1438_s16, 0 }
  0x55   : > { %1365 = dma.done.wait (%p1744_p11), [#allocation6], 3072   ;;  %p1745_p1 = pmov %p1744_p11 }
  0x56   : > { %v1234_v0 = vld [vmem:[#allocation5] sm:$0xff]   ;;  %v1235_v1 = vld [vmem:[#allocation5 + $0x8] sm:$0xff]   ;;  %v1236_v2 = vld [vmem:[#allocation5 + $0x10] sm:$0xff]   ;;  %s1659_s10 = scalar_lea.vmem [#allocation7], %s972_s7  ;;  %s1010_s11 = sshll.u32 %s1438_s16, 11 }
  0x57   : > { %1367 = vsyncadd (%p1745_p1), [#allocation6], 4294964224  ;;  %1059 = vmatprep.subr.bf16.mxu0 %v1234_v0  ;;  %v1237_v3 = vld [vmem:[#allocation5 + $0x18] sm:$0xff]   ;;  %v207_v4 = vld [vmem:[%s1562_s9] sm:$0xff]  ;;  %s881_s27 = sshll.u32 %s1659_s10, 4  ;;  %s1679_s23 = scalar_lea.hbm %s1731_s3, %s1010_s11  ;;  %s1681_s27 = int_to_ptr.vmem [resolvable:$true] %s881_s27 }
  0x58   : > { %1060 = vmatpush3.bf16.msra.mxu0 %v1234_v0  ;;  %v208_v5 = vld [vmem:[%s1562_s9 + $0x8] sm:$0xff]  ;;  %v1238_v7 = vld [vmem:[#allocation5 + $0x20] sm:$0xff]   ;;  %v1240_v11 = vld [vmem:[#allocation5 + $0x30] sm:$0xff]   ;;  %s868_s16 = scalar_lea.sflag [#allocation4], %s1556_s6  ;;  %s1316_s30 = scalar_lea.vmem %s1681_s27, 2048 }
  0x59   : > { %1061 = vmatprep.subr.bf16.mxu0 %v1235_v1  ;;  %v223_v6 = vpack.c.bf16 %v208_v5, %v207_v4  ;;  %v1242_v8 = vld [vmem:[#allocation5 + $0x40] sm:$0xff]   ;;  %v1243_v9 = vld [vmem:[#allocation5 + $0x48] sm:$0xff]   ;;  %v1244_v12 = vld [vmem:[#allocation5 + $0x50] sm:$0xff]   ;;  %p1317_p4 = scmp.ne.s32.totalorder %s1681_s27, %s1316_s30  ;;  %s1394_s22 = smov [#allocation7]  }
  0x5a   : > { %v1239_v10 = vld [vmem:[#allocation5 + $0x28] sm:$0xff]   ;;  %1091 = vmatprep.subr.bf16.mxu1 %v1242_v8  ;;  %v1245_v13 = vld [vmem:[#allocation5 + $0x58] sm:$0xff]   ;;  %v1246_v15 = vld [vmem:[#allocation5 + $0x60] sm:$0xff]   ;;  %s1320_s7 = sshll.u32 %s1394_s22, 4  ;;  %s1321_s7 = int_to_ptr.vmem [resolvable:$false] %s1320_s7 }
  0x5b   : > { %1075 = vmatprep.mubr.bf16.mxu0 %v223_v6  ;;  %1092 = vmatpush3.bf16.msra.mxu1 %v1242_v8  ;;  %v1241_v14 = vld [vmem:[#allocation5 + $0x38] sm:$0xff]   ;;  %v209_v16 = vld [vmem:[%s1562_s9 + $0x10] sm:$0xff]  ;;  %v211_v18 = vld [vmem:[%s1562_s9 + $0x20] sm:$0xff]  ;;  %p1318_p6 = pnand %p1317_p4, %p1508_p12  ;;  %s1322_s8 = scalar_lea.vmem %s1321_s7, 4096 }
  0x5c   : > { %1062 = vmatpush3.bf16.msra.mxu0 %v1235_v1  ;;  %1093 = vmatprep.subr.bf16.mxu1 %v1243_v9  ;;  %v210_v17 = vld [vmem:[%s1562_s9 + $0x18] sm:$0xff]  ;;  %v212_v19 = vld [vmem:[%s1562_s9 + $0x28] sm:$0xff]  ;;  %v213_v22 = vld [vmem:[%s1562_s9 + $0x30] sm:$0xff]  ;;  %p1323_p10 = scmp.lt.s32.totalorder %s1681_s27, %s1321_s7  ;;  %p1324_p13 = scmp.lt.s32.totalorder %s1322_s8, %s1316_s30 }
  0x5d   : > { %1063 = vmatprep.subr.bf16.mxu0 %v1236_v2  ;;  %v224_v20 = vpack.c.bf16 %v210_v17, %v209_v16  ;;  %v225_v21 = vpack.c.bf16 %v212_v19, %v211_v18  ;;  %v214_v23 = vld [vmem:[%s1562_s9 + $0x38] sm:$0xff]  ;;  %v215_v24 = vld [vmem:[%s1562_s9 + $0x40] sm:$0xff]  ;;  %v216_v25 = vld [vmem:[%s1562_s9 + $0x48] sm:$0xff]  ;;  %p1319_p8 = pneg %p1318_p6 }
  0x5e   : > { %v226_v26 = vpack.c.bf16 %v214_v23, %v213_v22  ;;  %v227_v27 = vpack.c.bf16 %v216_v25, %v215_v24  ;;  %v217_v28 = vld [vmem:[%s1562_s9 + $0x50] sm:$0xff]  ;;  %v218_v29 = vld [vmem:[%s1562_s9 + $0x58] sm:$0xff]  ;;  %v219_v30 = vld [vmem:[%s1562_s9 + $0x60] sm:$0xff]  ;;  %p1325_p3 = por %p1324_p13, %p1323_p10 }
  0x5f   : > { %1094 = vmatpush3.bf16.msra.mxu1 %v1243_v9  ;;  %v220_v31 = vld [vmem:[%s1562_s9 + $0x68] sm:$0xff]  ;;  %v228_v32 = vpack.c.bf16 %v218_v29, %v217_v28  ;;  %v221_v34 = vld [vmem:[%s1562_s9 + $0x70] sm:$0xff]  ;;  %v222_v35 = vld [vmem:[%s1562_s9 + $0x78] sm:$0xff] }
  0x60   : > { %1064 = vmatpush3.bf16.msra.mxu0 %v1236_v2  ;;  %1095 = vmatprep.subr.bf16.mxu1 %v1244_v12  ;;  %v229_v33 = vpack.c.bf16 %v220_v31, %v219_v30  ;;  %v230_v36 = vpack.c.bf16 %v222_v35, %v221_v34  ;;  %v1247_v37 = vld [vmem:[#allocation5 + $0x68] sm:$0xff]   ;;  %v1248_v38 = vld [vmem:[#allocation5 + $0x70] sm:$0xff]   ;;  %v1249_v39 = vld [vmem:[#allocation5 + $0x78] sm:$0xff]   ;;  %p1326_p7 = pnand %p1325_p3, %p1319_p8 }
  0x61   : > { %1065 = vmatprep.subr.bf16.mxu0 %v1237_v3  ;;  %v1250_v40 = vld [vmem:[#allocation5 + $0x80] sm:$0xff]   ;;  %v1588_v41 = vld [vmem:[#allocation5 + $0x88] sm:$0xff]   ;;  %v1591_v42 = vld [vmem:[#allocation5 + $0x90] sm:$0xff]  }
  0x62   : > { %v1595_v43 = vld [vmem:[#allocation5 + $0x98] sm:$0xff]   ;;  %v1599_v44 = vld [vmem:[#allocation5 + $0xa0] sm:$0xff]  }
  0x63   : > { %1096 = vmatpush3.bf16.msra.mxu1 %v1244_v12  ;;  %v1607_v45 = vld [vmem:[%s1730_s2] ss:$0 sm:$0xff] }
  0x64   : > { %1066 = vmatpush3.bf16.msra.mxu0 %v1237_v3  ;;  %1097 = vmatprep.subr.bf16.mxu1 %v1245_v13 }
  0x65   : > { %1067 = vmatprep.subr.bf16.mxu0 %v1238_v7 }
  0x67   : > { %1098 = vmatpush3.bf16.msra.mxu1 %v1245_v13 }
  0x68   : > { %1068 = vmatpush3.bf16.msra.mxu0 %v1238_v7  ;;  %1099 = vmatprep.subr.bf16.mxu1 %v1246_v15 }
  0x69   : > { %1069 = vmatprep.subr.bf16.mxu0 %v1239_v10 }
  0x6b   : > { %1100 = vmatpush3.bf16.msra.mxu1 %v1246_v15 }
  0x6c   : > { %1070 = vmatpush3.bf16.msra.mxu0 %v1239_v10  ;;  %1101 = vmatprep.subr.bf16.mxu1 %v1247_v37 }
  0x6d   : > { %1071 = vmatprep.subr.bf16.mxu0 %v1240_v11 }
  0x6f   : > { %1102 = vmatpush3.bf16.msra.mxu1 %v1247_v37 }
  0x70   : > { %1072 = vmatpush3.bf16.msra.mxu0 %v1240_v11  ;;  %1103 = vmatprep.subr.bf16.mxu1 %v1248_v38 }
  0x71   : > { %1073 = vmatprep.subr.bf16.mxu0 %v1241_v14 }
  0x73   : > { %1104 = vmatpush3.bf16.msra.mxu1 %v1248_v38 }
  0x74   : > { %1074 = vmatpush3.bf16.msra.mxu0 %v1241_v14  ;;  %1105 = vmatprep.subr.bf16.mxu1 %v1249_v39 }
  0x75   : > { %1123 = vmatprep.subr.bf16.mxu0 %v1250_v40 }
  0x77   : > { %1076 = vmatmul.mubr.bf16.vlgmr.msra.gmra.mrb[0].mxu0 %v224_v20  ;;  %1106 = vmatpush3.bf16.msra.mxu1 %v1249_v39 }
  0x78   : > { %1079 = vmatprep.mubr.bf16.mxu0 %v225_v21  ;;  %1155 = vmatprep.subr.bf16.mxu1 %v1250_v40 }
  0x79   : > { %1124 = vmatpush3.bf16.msra.mxu0 %v1250_v40 }
  0x7a   : > { %1125 = vmatprep.subr.bf16.mxu0 %v1588_v41 }
  0x7d   : > { %1126 = vmatpush3.bf16.msra.mxu0 %v1588_v41 }
  0x7e   : > { %1127 = vmatprep.subr.bf16.mxu0 %v1591_v42 }
  0x7f   : > { %1080 = vmatmul.mubr.bf16.gmra.mrb[4].mxu0 %v226_v26 }
  0x80   : > { %1083 = vmatprep.mubr.bf16.mxu0 %v227_v27 }
  0x81   : > { %1128 = vmatpush3.bf16.msra.mxu0 %v1591_v42 }
  0x82   : > { %1129 = vmatprep.subr.bf16.mxu0 %v1595_v43 }
  0x85   : > { %1130 = vmatpush3.bf16.msra.mxu0 %v1595_v43 }
  0x86   : > { %1131 = vmatprep.subr.bf16.mxu0 %v1599_v44 }
  0x87   : > { %1084 = vmatmul.mubr.bf16.gmra.mrb[8].mxu0 %v228_v32 }
  0x88   : > { %1087 = vmatprep.mubr.bf16.mxu0 %v229_v33 }
  0x89   : > { %1132 = vmatpush3.bf16.msra.mxu0 %v1599_v44 }
  0x8f   : > { %1088 = vmatmul.mubr.bf16.gmra.mrb[12].mxu0 %v230_v36 }
 0x14a   : > { %v1077_v46 = vpop.f32.mrb[0].mxu0 }
 0x14b   : > { %v345_v47 = vadd.f32 %v1077_v46, %v1607_v45  ;;  %v336_v48 = vpop.f32.mrb[1].mxu0 }
 0x14c   : > { %v337_v49 = vadd.f32 %v1607_v45, %v336_v48  ;;  %v1078_v50 = vpop.f32.mrb[2].mxu0 }
 0x14d   : > { %v417_v51 = vmul.f32 0.03, %v345_v47  ;;  %v348_v52 = vadd.f32 %v1078_v50, %v1607_v45  ;;  %v339_v53 = vpop.f32.mrb[3].mxu0  ;;  %vm401_vm0 = vcmp.ge.f32.partialorder %v345_v47, 0.0 }
 0x14e   : > { %v415_v54 = vmul.f32 0.03, %v337_v49  ;;  %v340_v55 = vadd.f32 %v1607_v45, %v339_v53  ;;  %vm399_vm2 = vcmp.ge.f32.partialorder %v337_v49, 0.0 }
 0x14f   : > { %vm402_vm1 = vcmp.ge.f32.partialorder %v348_v52, 0.0  ;;  %v418_v56 = vmul.f32 0.03, %v348_v52  ;;  %v433_v58 = vsel %vm401_vm0, %v345_v47, %v417_v51 }
 0x150   : > { %v416_v57 = vmul.f32 0.03, %v340_v55  ;;  %vm400_vm3 = vcmp.ge.f32.partialorder %v340_v55, 0.0  ;;  %v431_v61 = vsel %vm399_vm2, %v337_v49, %v415_v54 }
 0x151   : > { %v434_v59 = vsel %vm402_vm1, %v348_v52, %v418_v56  ;;  %v1255_v56 = vld [vmem:[#allocation5 + $0xa8] sm:$0xff]  }
 0x152   : > { %v1081_v60 = vpop.f32.mrb[4].mxu0  ;;  %v432_v62 = vsel %vm400_vm3, %v340_v55, %v416_v57  ;;  %v448_v63 = vpack.c.bf16 %v434_v59, %v433_v58  ;;  %1133 = vmatprep.subr.bf16.mxu0 %v1255_v56  ;;  %v1636_v57 = vld [vmem:[%s1730_s2 + $0x1] ss:$0 sm:$0xff] }
 0x153   : > { %v361_v0 = vadd.f32 %v1081_v60, %v1607_v45  ;;  %v352_v1 = vpop.f32.mrb[5].mxu0  ;;  %v447_v2 = vpack.c.bf16 %v432_v62, %v431_v61  ;;  %1134 = vmatpush3.bf16.msra.mxu0 %v1255_v56 }
 0x154   : > { %v353_v3 = vadd.f32 %v1607_v45, %v352_v1  ;;  %v1082_v4 = vpop.f32.mrb[6].mxu0 }
 0x155   : > { %v421_v5 = vmul.f32 0.03, %v361_v0  ;;  %v364_v6 = vadd.f32 %v1082_v4, %v1607_v45  ;;  %v355_v7 = vpop.f32.mrb[7].mxu0  ;;  %1107 = vmatprep.mubr.bf16.mxu1 %v447_v2  ;;  %vm405_vm4 = vcmp.ge.f32.partialorder %v361_v0, 0.0 }
 0x156   : > { %v419_v8 = vmul.f32 0.03, %v353_v3  ;;  %v356_v9 = vadd.f32 %v1607_v45, %v355_v7  ;;  %1108 = vmatmul.mubr.bf16.vlgmr.msra.gmra.mrb[0].mxu1 %v448_v63  ;;  %vm403_vm5 = vcmp.ge.f32.partialorder %v353_v3, 0.0 }
 0x157   : > { %vm406_vm6 = vcmp.ge.f32.partialorder %v364_v6, 0.0  ;;  %v422_v10 = vmul.f32 0.03, %v364_v6  ;;  %1163 = vmatpush3.bf16.msra.mxu1 %v1250_v40  ;;  %v437_v12 = vsel %vm405_vm4, %v361_v0, %v421_v5 }
 0x158   : > { %vm404_vm7 = vcmp.ge.f32.partialorder %v356_v9, 0.0  ;;  %v420_v11 = vmul.f32 0.03, %v356_v9  ;;  %1156 = vmatprep.subr.bf16.mxu1 %v1588_v41  ;;  %v435_v15 = vsel %vm403_vm5, %v353_v3, %v419_v8 }
 0x159   : > { %v438_v13 = vsel %vm406_vm6, %v364_v6, %v422_v10 }
 0x15a   : > { %v1085_v14 = vpop.f32.mrb[8].mxu0  ;;  %v436_v16 = vsel %vm404_vm7, %v356_v9, %v420_v11  ;;  %v450_v17 = vpack.c.bf16 %v438_v13, %v437_v12 }
 0x15b   : > { %v377_v18 = vadd.f32 %v1085_v14, %v1607_v45  ;;  %v368_v19 = vpop.f32.mrb[9].mxu0  ;;  %v449_v20 = vpack.c.bf16 %v436_v16, %v435_v15  ;;  %1164 = vmatpush3.bf16.msra.mxu1 %v1588_v41 }
 0x15c   : > { %v369_v21 = vadd.f32 %v1607_v45, %v368_v19  ;;  %v1086_v22 = vpop.f32.mrb[10].mxu0  ;;  %1157 = vmatprep.subr.bf16.mxu1 %v1591_v42 }
 0x15d   : > { %v425_v23 = vmul.f32 0.03, %v377_v18  ;;  %v380_v24 = vadd.f32 %v1086_v22, %v1607_v45  ;;  %v371_v25 = vpop.f32.mrb[11].mxu0  ;;  %1111 = vmatprep.mubr.bf16.mxu1 %v449_v20  ;;  %vm409_vm8 = vcmp.ge.f32.partialorder %v377_v18, 0.0 }
 0x15e   : > { %v423_v26 = vmul.f32 0.03, %v369_v21  ;;  %v372_v27 = vadd.f32 %v1607_v45, %v371_v25  ;;  %1112 = vmatmul.mubr.bf16.gmra.mrb[4].mxu1 %v450_v17  ;;  %vm407_vm9 = vcmp.ge.f32.partialorder %v369_v21, 0.0 }
 0x15f   : > { %vm410_vm10 = vcmp.ge.f32.partialorder %v380_v24, 0.0  ;;  %v426_v28 = vmul.f32 0.03, %v380_v24  ;;  %1165 = vmatpush3.bf16.msra.mxu1 %v1591_v42  ;;  %v441_v30 = vsel %vm409_vm8, %v377_v18, %v425_v23 }
 0x160   : > { %vm408_vm11 = vcmp.ge.f32.partialorder %v372_v27, 0.0  ;;  %v424_v29 = vmul.f32 0.03, %v372_v27  ;;  %1158 = vmatprep.subr.bf16.mxu1 %v1595_v43  ;;  %v439_v33 = vsel %vm407_vm9, %v369_v21, %v423_v26 }
 0x161   : > { %v442_v31 = vsel %vm410_vm10, %v380_v24, %v426_v28 }
 0x162   : > { %v1089_v32 = vpop.f32.mrb[12].mxu0  ;;  %v440_v34 = vsel %vm408_vm11, %v372_v27, %v424_v29  ;;  %v452_v35 = vpack.c.bf16 %v442_v31, %v441_v30 }
 0x163   : > { %v393_v36 = vadd.f32 %v1089_v32, %v1607_v45  ;;  %v384_v37 = vpop.f32.mrb[13].mxu0  ;;  %v451_v38 = vpack.c.bf16 %v440_v34, %v439_v33  ;;  %1166 = vmatpush3.bf16.msra.mxu1 %v1595_v43 }
 0x164   : > { %v385_v39 = vadd.f32 %v1607_v45, %v384_v37  ;;  %v1090_v40 = vpop.f32.mrb[14].mxu0  ;;  %1159 = vmatprep.subr.bf16.mxu1 %v1599_v44 }
 0x165   : > { %v429_v41 = vmul.f32 0.03, %v393_v36  ;;  %v396_v42 = vadd.f32 %v1090_v40, %v1607_v45  ;;  %v387_v46 = vpop.f32.mrb[15].mxu0  ;;  %1115 = vmatprep.mubr.bf16.mxu1 %v451_v38  ;;  %vm413_vm12 = vcmp.ge.f32.partialorder %v393_v36, 0.0 }
 0x166   : > { %v427_v47 = vmul.f32 0.03, %v385_v39  ;;  %v388_v48 = vadd.f32 %v1607_v45, %v387_v46  ;;  %1116 = vmatmul.mubr.bf16.gmra.mrb[8].mxu1 %v452_v35  ;;  %vm411_vm13 = vcmp.ge.f32.partialorder %v385_v39, 0.0  ;;  %v1256_v45 = vld [vmem:[#allocation5 + $0xb0] sm:$0xff]  }
 0x167   : > { %vm414_vm14 = vcmp.ge.f32.partialorder %v396_v42, 0.0  ;;  %v430_v49 = vmul.f32 0.03, %v396_v42  ;;  %1167 = vmatpush3.bf16.msra.mxu1 %v1599_v44  ;;  %v445_v50 = vsel %vm413_vm12, %v393_v36, %v429_v41  ;;  %1135 = vmatprep.subr.bf16.mxu0 %v1256_v45  ;;  %v1257_v44 = vld [vmem:[#allocation5 + $0xb8] sm:$0xff]  }
 0x168   : > { %vm412_vm15 = vcmp.ge.f32.partialorder %v388_v48, 0.0  ;;  %v428_v43 = vmul.f32 0.03, %v388_v48  ;;  %v443_v52 = vsel %vm411_vm13, %v385_v39, %v427_v47  ;;  %1160 = vmatprep.subr.bf16.mxu1 %v1255_v56  ;;  %1136 = vmatpush3.bf16.msra.mxu0 %v1256_v45 }
 0x169   : > { %v446_v51 = vsel %vm414_vm14, %v396_v42, %v430_v49  ;;  %1137 = vmatprep.subr.bf16.mxu0 %v1257_v44 }
 0x16a   : > { %v444_v53 = vsel %vm412_vm15, %v388_v48, %v428_v43  ;;  %v454_v54 = vpack.c.bf16 %v446_v51, %v445_v50 }
 0x16b   : > { %v453_v55 = vpack.c.bf16 %v444_v53, %v443_v52  ;;  %1168 = vmatpush3.bf16.msra.mxu1 %v1255_v56 }
 0x16c   : > { %1161 = vmatprep.subr.bf16.mxu1 %v1256_v45  ;;  %1138 = vmatpush3.bf16.msra.mxu0 %v1257_v44 }
 0x16d   : > { %1119 = vmatprep.mubr.bf16.mxu1 %v453_v55 }
 0x16e   : > { %1120 = vmatmul.mubr.bf16.gmra.mrb[12].mxu1 %v454_v54 }
 0x16f   : > { %1169 = vmatpush3.bf16.msra.mxu1 %v1256_v45 }
 0x170   : > { %1162 = vmatprep.subr.bf16.mxu1 %v1257_v44 }
 0x173   : > { %1170 = vmatpush3.bf16.msra.mxu1 %v1257_v44 }
 0x229   : > { %v1109_v58 = vpop.f32.mrb[0].mxu1 }
 0x22a   : > { %v571_v59 = vadd.f32 %v1109_v58, %v1636_v57  ;;  %v562_v60 = vpop.f32.mrb[1].mxu1 }
 0x22b   : > { %v563_v61 = vadd.f32 %v1636_v57, %v562_v60  ;;  %v1110_v62 = vpop.f32.mrb[2].mxu1 }
 0x22c   : > { %v643_v63 = vmul.f32 0.03, %v571_v59  ;;  %v574_v0 = vadd.f32 %v1110_v62, %v1636_v57  ;;  %v565_v1 = vpop.f32.mrb[3].mxu1  ;;  %vm627_vm0 = vcmp.ge.f32.partialorder %v571_v59, 0.0 }
 0x22d   : > { %v641_v2 = vmul.f32 0.03, %v563_v61  ;;  %v566_v3 = vadd.f32 %v1636_v57, %v565_v1  ;;  %vm625_vm1 = vcmp.ge.f32.partialorder %v563_v61, 0.0 }
 0x22e   : > { %vm628_vm2 = vcmp.ge.f32.partialorder %v574_v0, 0.0  ;;  %v644_v4 = vmul.f32 0.03, %v574_v0  ;;  %v659_v6 = vsel %vm627_vm0, %v571_v59, %v643_v63 }
 0x22f   : > { %vm626_vm3 = vcmp.ge.f32.partialorder %v566_v3, 0.0  ;;  %v642_v5 = vmul.f32 0.03, %v566_v3  ;;  %v657_v10 = vsel %vm625_vm1, %v563_v61, %v641_v2 }
 0x230   : > { %v660_v7 = vsel %vm628_vm2, %v574_v0, %v644_v4 }
 0x231   : > { %v674_v8 = vpack.c.bf16 %v660_v7, %v659_v6  ;;  %v1113_v9 = vpop.f32.mrb[4].mxu1  ;;  %v658_v11 = vsel %vm626_vm3, %v566_v3, %v642_v5  ;;  %v995_v3 = vld [vmem:[%s1730_s2 + $0x2] ss:$0 sm:$0xff] }
 0x232   : > { %v587_v12 = vadd.f32 %v1113_v9, %v1636_v57  ;;  %v578_v13 = vpop.f32.mrb[5].mxu1  ;;  %v673_v14 = vpack.c.bf16 %v658_v11, %v657_v10 }
 0x233   : > { %v579_v15 = vadd.f32 %v1636_v57, %v578_v13  ;;  %v1114_v16 = vpop.f32.mrb[6].mxu1 }
 0x234   : > { %v647_v17 = vmul.f32 0.03, %v587_v12  ;;  %v590_v18 = vadd.f32 %v1114_v16, %v1636_v57  ;;  %v581_v19 = vpop.f32.mrb[7].mxu1  ;;  %1139 = vmatprep.mubr.bf16.mxu0 %v673_v14  ;;  %vm631_vm4 = vcmp.ge.f32.partialorder %v587_v12, 0.0 }
 0x235   : > { %v645_v20 = vmul.f32 0.03, %v579_v15  ;;  %v582_v21 = vadd.f32 %v1636_v57, %v581_v19  ;;  %1140 = vmatmul.mubr.bf16.vlgmr.msra.gmra.mrb[16].mxu0 %v674_v8  ;;  %vm629_vm5 = vcmp.ge.f32.partialorder %v579_v15, 0.0 }
 0x236   : > { %vm632_vm6 = vcmp.ge.f32.partialorder %v590_v18, 0.0  ;;  %v648_v22 = vmul.f32 0.03, %v590_v18  ;;  %v663_v24 = vsel %vm631_vm4, %v587_v12, %v647_v17 }
 0x237   : > { %vm630_vm7 = vcmp.ge.f32.partialorder %v582_v21, 0.0  ;;  %v646_v23 = vmul.f32 0.03, %v582_v21  ;;  %v661_v27 = vsel %vm629_vm5, %v579_v15, %v645_v20 }
 0x238   : > { %v664_v25 = vsel %vm632_vm6, %v590_v18, %v648_v22 }
 0x239   : > { %v1117_v26 = vpop.f32.mrb[8].mxu1  ;;  %v662_v28 = vsel %vm630_vm7, %v582_v21, %v646_v23  ;;  %v676_v29 = vpack.c.bf16 %v664_v25, %v663_v24 }
 0x23a   : > { %v603_v30 = vadd.f32 %v1117_v26, %v1636_v57  ;;  %v594_v31 = vpop.f32.mrb[9].mxu1  ;;  %v675_v32 = vpack.c.bf16 %v662_v28, %v661_v27 }
 0x23b   : > { %v595_v33 = vadd.f32 %v1636_v57, %v594_v31  ;;  %v1118_v34 = vpop.f32.mrb[10].mxu1 }
 0x23c   : > { %v651_v35 = vmul.f32 0.03, %v603_v30  ;;  %v606_v36 = vadd.f32 %v1118_v34, %v1636_v57  ;;  %v597_v37 = vpop.f32.mrb[11].mxu1  ;;  %1143 = vmatprep.mubr.bf16.mxu0 %v675_v32  ;;  %vm635_vm8 = vcmp.ge.f32.partialorder %v603_v30, 0.0 }
 0x23d   : > { %v649_v38 = vmul.f32 0.03, %v595_v33  ;;  %v598_v39 = vadd.f32 %v1636_v57, %v597_v37  ;;  %1144 = vmatmul.mubr.bf16.gmra.mrb[20].mxu0 %v676_v29  ;;  %vm633_vm9 = vcmp.ge.f32.partialorder %v595_v33, 0.0 }
 0x23e   : > { %vm636_vm10 = vcmp.ge.f32.partialorder %v606_v36, 0.0  ;;  %v652_v40 = vmul.f32 0.03, %v606_v36  ;;  %v667_v42 = vsel %vm635_vm8, %v603_v30, %v651_v35 }
 0x23f   : > { %vm634_vm11 = vcmp.ge.f32.partialorder %v598_v39, 0.0  ;;  %v650_v41 = vmul.f32 0.03, %v598_v39  ;;  %v665_v49 = vsel %vm633_vm9, %v595_v33, %v649_v38 }
 0x240   : > { %v668_v46 = vsel %vm636_vm10, %v606_v36, %v652_v40 }
 0x241   : > { %v678_v47 = vpack.c.bf16 %v668_v46, %v667_v42  ;;  %v1121_v48 = vpop.f32.mrb[12].mxu1  ;;  %v666_v43 = vsel %vm634_vm11, %v598_v39, %v650_v41 }
 0x242   : > { %v619_v50 = vadd.f32 %v1121_v48, %v1636_v57  ;;  %v610_v51 = vpop.f32.mrb[13].mxu1  ;;  %v677_v52 = vpack.c.bf16 %v666_v43, %v665_v49 }
 0x243   : > { %v611_v53 = vadd.f32 %v1636_v57, %v610_v51  ;;  %v1122_v54 = vpop.f32.mrb[14].mxu1 }
 0x244   : > { %v655_v55 = vmul.f32 0.03, %v619_v50  ;;  %v622_v56 = vadd.f32 %v1122_v54, %v1636_v57  ;;  %v613_v45 = vpop.f32.mrb[15].mxu1  ;;  %1147 = vmatprep.mubr.bf16.mxu1 %v677_v52  ;;  %vm639_vm12 = vcmp.ge.f32.partialorder %v619_v50, 0.0 }
 0x245   : > { %v653_v44 = vmul.f32 0.03, %v611_v53  ;;  %v614_v58 = vadd.f32 %v1636_v57, %v613_v45  ;;  %1148 = vmatmul.mubr.bf16.vlgmr.msra.gmra.mrb[16].mxu1 %v678_v47  ;;  %vm637_vm13 = vcmp.ge.f32.partialorder %v611_v53, 0.0 }
 0x246   : > { %vm640_vm14 = vcmp.ge.f32.partialorder %v622_v56, 0.0  ;;  %v656_v59 = vmul.f32 0.03, %v622_v56  ;;  %v671_v61 = vsel %vm639_vm12, %v619_v50, %v655_v55 }
 0x247   : > { %vm638_vm15 = vcmp.ge.f32.partialorder %v614_v58, 0.0  ;;  %v654_v60 = vmul.f32 0.03, %v614_v58  ;;  %v669_v63 = vsel %vm637_vm13, %v611_v53, %v653_v44 }
 0x248   : > { %v672_v62 = vsel %vm640_vm14, %v622_v56, %v656_v59 }
 0x249   : > { %v670_v0 = vsel %vm638_vm15, %v614_v58, %v654_v60  ;;  %v680_v1 = vpack.c.bf16 %v672_v62, %v671_v61 }
 0x24a   : > { %v679_v2 = vpack.c.bf16 %v670_v0, %v669_v63 }
 0x24c   : > { %1151 = vmatprep.mubr.bf16.mxu1 %v679_v2 }
 0x24d   : > { %1152 = vmatmul.mubr.bf16.gmra.mrb[20].mxu1 %v680_v1 }
 0x308   : > { %v1141_v57 = vpop.f32.mrb[16].mxu0 }
 0x309   : > { %v797_v4 = vadd.f32 %v1141_v57, %v995_v3  ;;  %v788_v5 = vpop.f32.mrb[17].mxu0 }
 0x30a   : > { %v789_v6 = vadd.f32 %v995_v3, %v788_v5  ;;  %v1142_v7 = vpop.f32.mrb[18].mxu0 }
 0x30b   : > { %853 = vst [vmem:[%s1659_s10 + $0x10] sm:$0xff] %v797_v4  ;;  %v800_v8 = vadd.f32 %v1142_v7, %v995_v3  ;;  %v791_v9 = vpop.f32.mrb[19].mxu0 }
 0x30c   : > { %851 = vst [vmem:[%s1659_s10] sm:$0xff] %v789_v6  ;;  %v792_v10 = vadd.f32 %v995_v3, %v791_v9 }
 0x30d   : > { %854 = vst [vmem:[%s1659_s10 + $0x18] sm:$0xff] %v800_v8 }
 0x30e   : > { %852 = vst [vmem:[%s1659_s10 + $0x8] sm:$0xff] %v792_v10 }
 0x310   : > { %v1145_v11 = vpop.f32.mrb[20].mxu0 }
 0x311   : > { %v813_v12 = vadd.f32 %v1145_v11, %v995_v3  ;;  %v804_v13 = vpop.f32.mrb[21].mxu0 }
 0x312   : > { %v805_v14 = vadd.f32 %v995_v3, %v804_v13  ;;  %v1146_v15 = vpop.f32.mrb[22].mxu0 }
 0x313   : > { %857 = vst [vmem:[%s1659_s10 + $0x30] sm:$0xff] %v813_v12  ;;  %v816_v16 = vadd.f32 %v1146_v15, %v995_v3  ;;  %v807_v17 = vpop.f32.mrb[23].mxu0 }
 0x314   : > { %855 = vst [vmem:[%s1659_s10 + $0x20] sm:$0xff] %v805_v14  ;;  %v808_v18 = vadd.f32 %v995_v3, %v807_v17 }
 0x315   : > { %858 = vst [vmem:[%s1659_s10 + $0x38] sm:$0xff] %v816_v16 }
 0x316   : > { %856 = vst [vmem:[%s1659_s10 + $0x28] sm:$0xff] %v808_v18 }
 0x318   : > { %v1149_v19 = vpop.f32.mrb[16].mxu1 }
 0x319   : > { %v829_v20 = vadd.f32 %v1149_v19, %v995_v3  ;;  %v820_v21 = vpop.f32.mrb[17].mxu1 }
 0x31a   : > { %v821_v22 = vadd.f32 %v995_v3, %v820_v21  ;;  %v1150_v23 = vpop.f32.mrb[18].mxu1 }
 0x31b   : > { %861 = vst [vmem:[%s1659_s10 + $0x50] sm:$0xff] %v829_v20  ;;  %v832_v24 = vadd.f32 %v1150_v23, %v995_v3  ;;  %v823_v25 = vpop.f32.mrb[19].mxu1 }
 0x31c   : > { %859 = vst [vmem:[%s1659_s10 + $0x40] sm:$0xff] %v821_v22  ;;  %v824_v26 = vadd.f32 %v995_v3, %v823_v25 }
 0x31d   : > { %862 = vst [vmem:[%s1659_s10 + $0x58] sm:$0xff] %v832_v24 }
 0x31e   : > { %860 = vst [vmem:[%s1659_s10 + $0x48] sm:$0xff] %v824_v26 }
 0x320   : > { %v1153_v27 = vpop.f32.mrb[20].mxu1 }
 0x321   : > { %v845_v28 = vadd.f32 %v1153_v27, %v995_v3  ;;  %v836_v29 = vpop.f32.mrb[21].mxu1 }
 0x322   : > { %v837_v30 = vadd.f32 %v995_v3, %v836_v29  ;;  %v1154_v31 = vpop.f32.mrb[22].mxu1 }
 0x323   : > { %865 = vst [vmem:[%s1659_s10 + $0x70] sm:$0xff] %v845_v28  ;;  %v848_v32 = vadd.f32 %v1154_v31, %v995_v3  ;;  %v839_v33 = vpop.f32.mrb[23].mxu1 }
 0x324   : > { %863 = vst [vmem:[%s1659_s10 + $0x60] sm:$0xff] %v837_v30  ;;  %v840_v34 = vadd.f32 %v995_v3, %v839_v33 }
 0x325   : > { %866 = vst [vmem:[%s1659_s10 + $0x78] sm:$0xff] %v848_v32 }
 0x326   : > { %864 = vst [vmem:[%s1659_s10 + $0x68] sm:$0xff] %v840_v34 }
 0x327   : > { %1329 = shalt.err (!%p1326_p7)
}
 0x328   : > { %s1330_s9 = scalar_lea.hbm %s1679_s23, 2048  ;;  %s1334_s4 = scalar_lea.hbm %s1731_s3, 4096 }
 0x329   : > { %p1331_p9 = scmp.ne.s32.totalorder %s1679_s23, %s1330_s9  ;;  %p1335_p5 = scmp.lt.u32.totalorder %s1679_s23, %s1731_s3 }
 0x32a   : > { %p1336_p11 = scmp.lt.u32.totalorder %s1334_s4, %s1330_s9  ;;  %p1338_p4 = scmp.lt.u32.totalorder %s1330_s9, %s1679_s23 }
 0x32b   : > { %p1332_p2 = pnand %p1331_p9, %p1508_p12 }
 0x32c   : > { %p1337_p1 = por %p1336_p11, %p1335_p5 }
 0x32d   : > { %p1333_p0 = pneg %p1332_p2 }
 0x32e   : > { %p1339_p6 = por %p1338_p4, %p1337_p1 }
 0x330   : > { %p1340_p8 = pnand %p1339_p6, %p1333_p0 }
 0x332   : > { %1343 = shalt.err (!%p1340_p8)
}
 0x333   : > { %s1395_s5 = smov 128   ;;  %s1396_s10 = smov 8  }
 0x334   : > { %1177 = dma.vmem_to_hbm [thread:$0]  (%p1508_p12), %s1681_s27, 2048, %s1679_s23, %s868_s16, %s1395_s5, %s1395_s5, %s1396_s10  }
 0x335 PF: > { %s896_s11 = sand.u32 1, %s1374_s12   ;;  %p1746_p10 = scmp.ne.s32.totalorder %s1736_s19, 0 }
 0x336   : > { %p1747_p13 = scmp.ge.s32.totalorder %s1386_s15, 2  ;;  %s897_s28 = scalar_lea.sflag [#allocation4], %s896_s11 }
 0x338   : > { %p1188_p3 = pnand %p1747_p13, %p1746_p10 }
 0x33a   : > { %1369 = dma.done.wait (!%p1188_p3), %s897_s28, 2048  }
 0x33b   : > { %1371 = vsyncadd (!%p1188_p3), %s897_s28, 4294965248  ;;  %p17_p7 = scmp.ge.s32.totalorder %s1473_s24, 4   ;;  %s1748_s12 = smov %s1378_s13 }
 0x33c   : > { %s1749_s13 = smov %s1382_s14  ;;  %s1750_s14 = smov %s1504_s17 }
 0x33d   : > { %s1751_s15 = smov %s1473_s24  ;;  %19 = sbr.rel (!%p17_p7) target bundleno = 6 (0x6), region = 85 }
 0x344   :  { %902 = vsyncpa [#allocation3], 1 }
 0x345   :  { %904 = vsyncpa [#allocation3 + $0x1], 1 }
 0x346   :  { %905 = vsyncpa [#allocation6], 1 }
 0x347   :  { %906 = vsyncpa [#allocation4], 1 }
 0x348   :  { %908 = vsyncpa [#allocation4 + $0x1], 1 }

</bundles_post_ra>
